<compile_context>
chip_gen: v7x
topology: tpu7x:2x2x1
jax: 0.10.0
libtpu: 0.0.40
codegen_flags: <defaults>
</compile_context>

<pallas_src>
import functools

import numpy as np
import jax
import jax.numpy as jnp
from jax import lax
from jax.experimental import pallas as pl
from jax.experimental.pallas import tpu as pltpu

NEG = -1e30            # finite -inf surrogate (avoids NaN from inf - inf)
LANES = 128            # lane-group width
WIDE_TILE = 1024       # target batch-tile width in lanes (review: 512-1024)
VMEM_BUDGET = 8 * 1024 * 1024   # cap for the double-buffered lp input per grid step
UNROLL_THRESHOLD = 32  # fully unroll the time loop below this T


def ctc_alpha_kernel(lp_ref, skip_ref, loss_ref, *, S):
    """CTC forward (alpha) recursion for one batch tile.

    lp_ref    : (T, S_PAD, B) f32   lp[t, s, b] = log P(ext_label[b, s] at time t)
                                    (rows s >= S hold blank log-probs; masked in-kernel)
    skip_ref  : (S_PAD, B)    f32   additive bias: 0.0 where the s-2 skip transition is
                                    legal, NEG elsewhere (rows 0..2 and padding = NEG)
    loss_ref  : (1, B)        f32   output: per-sample -log p(target)
    """
    T = lp_ref.shape[0]
    s_pad, b = skip_ref.shape
    neg = jnp.float32(NEG)

    s_iota = lax.broadcasted_iota(jnp.int32, (s_pad, b), 0)   # sublane index
    valid = s_iota < S                                         # S < S_PAD always (S odd)
    skip_bias = skip_ref[...]

    # alpha_0: only s=0 (blank) and s=1 (first label) are reachable.
    alpha0 = jnp.where(s_iota <= 1, lp_ref[0], neg)            # (S_PAD, B)

    def step(t, alpha):
        # Row 0 of the s-1 roll wraps sublane S_PAD-1, which is an always-NEG padding
        # row (S_PAD > S since S = 2L+1 is odd) -> no extra mask needed.
        a1 = pltpu.roll(alpha, 1, axis=0)                      # alpha[s-1]
        a2 = pltpu.roll(alpha, 2, axis=0) + skip_bias          # alpha[s-2], gated
        m = jnp.maximum(jnp.maximum(alpha, a1), a2)
        lse = m + jnp.log(jnp.exp(alpha - m) + jnp.exp(a1 - m) + jnp.exp(a2 - m))
        return jnp.where(valid, lp_ref[t] + lse, neg)          # per-t load (no big block)

    if T <= UNROLL_THRESHOLD:
        alpha = alpha0
        for t in range(1, T):                                  # small static T: unroll
            alpha = step(t, alpha)
    else:
        alpha = lax.fori_loop(1, T, step, alpha0, unroll=8)    # realistic T: bounded live ranges

    # loss = -logsumexp(alpha[S-1], alpha[S-2])   (static sublane rows)
    a_hi = alpha[S - 1:S, :]
    a_lo = alpha[S - 2:S - 1, :]
    m = jnp.maximum(a_hi, a_lo)
    loss_ref[...] = -(m + jnp.log(jnp.exp(a_hi - m) + jnp.exp(a_lo - m)))


def _pick_batch_tile(T, S_PAD, N):
    """Batch tile (lanes per grid step) and padded batch size."""
    per_lane = 2 * T * S_PAD * 4                    # double-buffered f32 lp bytes / lane
    by_vmem = max(LANES, (VMEM_BUDGET // per_lane) // LANES * LANES)
    wide = min(WIDE_TILE, by_vmem)

    if N <= LANES:
        return N, N                                 # tiny batch: one step, full array block
    n_lanes = pl.cdiv(N, LANES) * LANES
    b_tile = min(wide, n_lanes)
    # Keep >= 2 grid steps so v7x's two TensorCores both get work (neutral on v5e/v6e).
    if n_lanes // b_tile < 2 and n_lanes >= 2 * LANES:
        b_tile = max(LANES, (n_lanes // 2) // LANES * LANES)
    n_pad = pl.cdiv(n_lanes, b_tile) * b_tile
    return b_tile, n_pad


def _ctc_loss_impl(logit_tnc, targets):
    """CTC loss, reduction='mean', blank=0, fixed target length = targets.shape[1]."""
    T, N, C = logit_tnc.shape
    L = targets.shape[1]
    S = 2 * L + 1
    S_PAD = 8 * ((S + 7) // 8)

    logit = logit_tnc.astype(jnp.float32)          # (T, N, C), time-major as in torch
    targets = targets.astype(jnp.int32)

    # Extended label sequence [blank, t0, blank, t1, blank, <blank padding to S_PAD>].
    # Padding columns gather real blank log-probs; the kernel's `valid` mask keeps them
    # out of the recursion, so no NEG-concatenate pass over the (T, S_PAD, N) slab.
    ext = jnp.zeros((N, S_PAD), jnp.int32).at[:, 1:S:2].set(targets)      # (N, S_PAD)

    # One gather pass over the big operand, laid out lane-dense (batch-last) exactly as
    # the kernel consumes it: lp[t, s, b] = logit[t, b, ext[b, s]].
    idx = jnp.broadcast_to(ext[None, :, :], (T, N, S_PAD))
    lp = jnp.take_along_axis(logit, idx, axis=2)                          # (T, N, S_PAD)
    lp = jnp.transpose(lp, (0, 2, 1))                                     # (T, S_PAD, N)
    # TODO(synk): for very large C/N, a bf16 one-hot einsum or an in-kernel SMEM gather
    # of ext may beat this XLA gather+transpose chain; kept simple + exact here.

    # Additive skip bias: 0.0 at odd s >= 3 when label differs from s-2, NEG elsewhere
    # (rows 0..2 stay NEG, which also gates the sublane wrap of roll(alpha, 2)).
    skip = jnp.full((S_PAD, N), NEG, jnp.float32)
    for j in range(1, L):
        bias = jnp.where(targets[:, j] != targets[:, j - 1], 0.0, NEG).astype(jnp.float32)
        skip = skip.at[2 * j + 1, :].set(bias)

    b_tile, n_pad = _pick_batch_tile(T, S_PAD, N)
    if n_pad != N:
        lp = jnp.pad(lp, ((0, 0), (0, 0), (0, n_pad - N)))
        skip = jnp.pad(skip, ((0, 0), (0, n_pad - N)))

    cost = pl.CostEstimate(
        flops=int(8 * T * S_PAD * n_pad),
        transcendentals=int(4 * (T - 1) * S_PAD * n_pad),
        bytes_accessed=int(4 * (T * S_PAD * n_pad + S_PAD * n_pad + n_pad)),
    )

    out = pl.pallas_call(
        functools.partial(ctc_alpha_kernel, S=S),
        out_shape=jax.ShapeDtypeStruct((1, n_pad), jnp.float32),
        grid=(n_pad // b_tile,),
        in_specs=[
            pl.BlockSpec((T, S_PAD, b_tile), lambda i: (0, 0, i)),
            pl.BlockSpec((S_PAD, b_tile), lambda i: (0, i)),
        ],
        out_specs=pl.BlockSpec((1, b_tile), lambda i: (0, i)),
        compiler_params=pltpu.CompilerParams(
            dimension_semantics=("parallel",)),
        cost_estimate=cost,
    )(lp, skip)

    per_sample_nll = out[0, :N]                          # (N,)
    return jnp.mean(per_sample_nll / jnp.float32(L))     # torch 'mean' reduction


ctc_loss_pallas = jax.jit(_ctc_loss_impl)


class CTCLossPallas:
    """JAX/Pallas mirror of CTCLoss_torch."""

    def __init__(self, max_sequence_length, max_label_length, batch_size):
        self.sequence_length = jnp.full((batch_size,), max_sequence_length, jnp.int32)
        li = np.array([[i, j] for i in range(batch_size)
                       for j in range(max_label_length)], dtype=np.int64)
        self.labels_indices = jnp.asarray(li)
        self.max_label_length = max_label_length

    def __call__(self, logit, label):
        # `label` is ignored, exactly as in the PyTorch module.
        T, N, C = logit.shape
        # TODO(synk): torch.randint draws fresh random targets (in [1, 20)) on every
        # forward; reproduced here with a fixed jax.random key for determinism.
        # Note: if C < 20 the gather would silently clamp out-of-range classes.
        targets = jax.random.randint(jax.random.PRNGKey(42), (N, 2), 1, 20,
                                     dtype=jnp.int32)
        self.last_targets = targets
        return ctc_loss_pallas(logit, targets)


def ctc_loss_reference(logits_tnc, targets, blank=0):
    """Pure numpy float64 CTC (reduction='mean') for verification."""
    T, N, C = logits_tnc.shape
    losses = []
    for bi in range(N):
        ext = [blank]
        for t in targets[bi]:
            ext.extend([int(t), blank])
        S = len(ext)
        lp = logits_tnc[:, bi, :].astype(np.float64)
        alpha = np.full(S, -np.inf)
        alpha[0] = lp[0, ext[0]]
        alpha[1] = lp[0, ext[1]]
        for t in range(1, T):
            new = np.full(S, -np.inf)
            for s in range(S):
                cands = [alpha[s]]
                if s >= 1:
                    cands.append(alpha[s - 1])
                if s >= 2 and ext[s] != blank and ext[s] != ext[s - 2]:
                    cands.append(alpha[s - 2])
                m = max(cands)
                if np.isneginf(m):
                    continue
                new[s] = lp[t, ext[s]] + m + np.log(sum(np.exp(c - m) for c in cands))
            alpha = new
        m = max(alpha[-1], alpha[-2])
        ll = m + np.log(np.exp(alpha[-1] - m) + np.exp(alpha[-2] - m))
        losses.append(-ll)
    losses = np.asarray(losses)
    return float(np.mean(losses / float(targets.shape[1])))


if __name__ == "__main__":
    T, N, C = 16, 2, 32          # max_sequence_length=16, batch=2, num classes=32
    max_label_length = 4

    key = jax.random.PRNGKey(0)
    k_logit, _ = jax.random.split(key)
    # torch passes raw network outputs; here we build valid log-probs (log_softmax).
    logit = jax.nn.log_softmax(
        jax.random.normal(k_logit, (T, N, C), dtype=jnp.float32), axis=-1)
    label = jnp.zeros((N, max_label_length), jnp.int32)   # ignored, as in torch

    module = CTCLossPallas(T, max_label_length, N)
    loss = module(logit, label)
    loss = jax.block_until_ready(loss)

    ref = ctc_loss_reference(np.asarray(logit), np.asarray(module.last_targets))
    if not np.allclose(float(loss), ref, rtol=1e-3, atol=1e-3):
        raise AssertionError(f"Pallas CTC {float(loss)} != reference {ref}")

    print("KERNEL_OK")
</pallas_src>

<mosaic_0001>
module attributes {stable_mosaic.version = 11 : i64} {
  func.func @ctc_alpha_kernel(%arg0: i32, %arg1: memref<16x8x2xf32, #tpu.memory_space<vmem>>, %arg2: memref<8x2xf32, #tpu.memory_space<vmem>>, %arg3: memref<1x2xf32, #tpu.memory_space<vmem>>) attributes {dimension_semantics = [#tpu.dimension_semantics<parallel>], iteration_bounds = array<i64: 1>, scalar_prefetch = 0 : i64, scratch_operands = 0 : i64, tpu.core_type = #tpu.core_type<tc>, window_params = [{transform_indices = @transform_0, window_bounds = array<i64: 16, 8, 2>}, {transform_indices = @transform_1, window_bounds = array<i64: 8, 2>}, {transform_indices = @transform_2, window_bounds = array<i64: 1, 2>}]} {
    %0 = tpu.iota {dimensions = array<i32: 0>} : vector<8x2xi32>
    %c5_i32 = arith.constant 5 : i32
    %1 = vector.broadcast %c5_i32 : i32 to vector<8x2xi32>
    %2 = arith.cmpi slt, %0, %1 : vector<8x2xi32>
    %c0 = arith.constant 0 : index
    %c0_0 = arith.constant 0 : index
    %3 = vector.load %arg2[%c0, %c0_0] : memref<8x2xf32, #tpu.memory_space<vmem>>, vector<8x2xf32>
    %c1_i32 = arith.constant 1 : i32
    %4 = vector.broadcast %c1_i32 : i32 to vector<8x2xi32>
    %5 = arith.cmpi sle, %0, %4 : vector<8x2xi32>
    %c0_1 = arith.constant 0 : index
    %c0_2 = arith.constant 0 : index
    %c0_3 = arith.constant 0 : index
    %6 = vector.load %arg1[%c0_1, %c0_2, %c0_3] : memref<16x8x2xf32, #tpu.memory_space<vmem>>, vector<1x8x2xf32>
    %7 = vector.shape_cast %6 : vector<1x8x2xf32> to vector<8x2xf32>
    %cst = arith.constant -1.000000e+30 : f32
    %8 = vector.broadcast %cst : f32 to vector<8x2xf32>
    %9 = arith.select %5, %7, %8 : vector<8x2xi1>, vector<8x2xf32>
    %c1_i32_4 = arith.constant 1 : i32
    %10 = tpu.dynamic_rotate %9 by %c1_i32_4 dim 0 : vector<8x2xf32>, i32 -> vector<8x2xf32>
    %c2_i32 = arith.constant 2 : i32
    %11 = tpu.dynamic_rotate %9 by %c2_i32 dim 0 : vector<8x2xf32>, i32 -> vector<8x2xf32>
    %12 = arith.addf %11, %3 : vector<8x2xf32>
    %13 = arith.maximumf %9, %10 : vector<8x2xf32>
    %14 = arith.maximumf %13, %12 : vector<8x2xf32>
    %15 = arith.subf %9, %14 : vector<8x2xf32>
    %16 = math.exp %15 : vector<8x2xf32>
    %17 = arith.subf %10, %14 : vector<8x2xf32>
    %18 = math.exp %17 : vector<8x2xf32>
    %19 = arith.addf %16, %18 : vector<8x2xf32>
    %20 = arith.subf %12, %14 : vector<8x2xf32>
    %21 = math.exp %20 : vector<8x2xf32>
    %22 = arith.addf %19, %21 : vector<8x2xf32>
    %23 = math.log %22 : vector<8x2xf32>
    %24 = arith.addf %14, %23 : vector<8x2xf32>
    %c1 = arith.constant 1 : index
    %c0_5 = arith.constant 0 : index
    %c0_6 = arith.constant 0 : index
    %25 = vector.load %arg1[%c1, %c0_5, %c0_6] : memref<16x8x2xf32, #tpu.memory_space<vmem>>, vector<1x8x2xf32>
    %26 = vector.shape_cast %25 : vector<1x8x2xf32> to vector<8x2xf32>
    %27 = arith.addf %26, %24 : vector<8x2xf32>
    %cst_7 = arith.constant -1.000000e+30 : f32
    %28 = vector.broadcast %cst_7 : f32 to vector<8x2xf32>
    %29 = arith.select %2, %27, %28 : vector<8x2xi1>, vector<8x2xf32>
    %c1_i32_8 = arith.constant 1 : i32
    %30 = tpu.dynamic_rotate %29 by %c1_i32_8 dim 0 : vector<8x2xf32>, i32 -> vector<8x2xf32>
    %c2_i32_9 = arith.constant 2 : i32
    %31 = tpu.dynamic_rotate %29 by %c2_i32_9 dim 0 : vector<8x2xf32>, i32 -> vector<8x2xf32>
    %32 = arith.addf %31, %3 : vector<8x2xf32>
    %33 = arith.maximumf %29, %30 : vector<8x2xf32>
    %34 = arith.maximumf %33, %32 : vector<8x2xf32>
    %35 = arith.subf %29, %34 : vector<8x2xf32>
    %36 = math.exp %35 : vector<8x2xf32>
    %37 = arith.subf %30, %34 : vector<8x2xf32>
    %38 = math.exp %37 : vector<8x2xf32>
    %39 = arith.addf %36, %38 : vector<8x2xf32>
    %40 = arith.subf %32, %34 : vector<8x2xf32>
    %41 = math.exp %40 : vector<8x2xf32>
    %42 = arith.addf %39, %41 : vector<8x2xf32>
    %43 = math.log %42 : vector<8x2xf32>
    %44 = arith.addf %34, %43 : vector<8x2xf32>
    %c2 = arith.constant 2 : index
    %c0_10 = arith.constant 0 : index
    %c0_11 = arith.constant 0 : index
    %45 = vector.load %arg1[%c2, %c0_10, %c0_11] : memref<16x8x2xf32, #tpu.memory_space<vmem>>, vector<1x8x2xf32>
    %46 = vector.shape_cast %45 : vector<1x8x2xf32> to vector<8x2xf32>
    %47 = arith.addf %46, %44 : vector<8x2xf32>
    %cst_12 = arith.constant -1.000000e+30 : f32
    %48 = vector.broadcast %cst_12 : f32 to vector<8x2xf32>
    %49 = arith.select %2, %47, %48 : vector<8x2xi1>, vector<8x2xf32>
    %c1_i32_13 = arith.constant 1 : i32
    %50 = tpu.dynamic_rotate %49 by %c1_i32_13 dim 0 : vector<8x2xf32>, i32 -> vector<8x2xf32>
    %c2_i32_14 = arith.constant 2 : i32
    %51 = tpu.dynamic_rotate %49 by %c2_i32_14 dim 0 : vector<8x2xf32>, i32 -> vector<8x2xf32>
    %52 = arith.addf %51, %3 : vector<8x2xf32>
    %53 = arith.maximumf %49, %50 : vector<8x2xf32>
    %54 = arith.maximumf %53, %52 : vector<8x2xf32>
    %55 = arith.subf %49, %54 : vector<8x2xf32>
    %56 = math.exp %55 : vector<8x2xf32>
    %57 = arith.subf %50, %54 : vector<8x2xf32>
    %58 = math.exp %57 : vector<8x2xf32>
    %59 = arith.addf %56, %58 : vector<8x2xf32>
    %60 = arith.subf %52, %54 : vector<8x2xf32>
    %61 = math.exp %60 : vector<8x2xf32>
    %62 = arith.addf %59, %61 : vector<8x2xf32>
    %63 = math.log %62 : vector<8x2xf32>
    %64 = arith.addf %54, %63 : vector<8x2xf32>
    %c3 = arith.constant 3 : index
    %c0_15 = arith.constant 0 : index
    %c0_16 = arith.constant 0 : index
    %65 = vector.load %arg1[%c3, %c0_15, %c0_16] : memref<16x8x2xf32, #tpu.memory_space<vmem>>, vector<1x8x2xf32>
    %66 = vector.shape_cast %65 : vector<1x8x2xf32> to vector<8x2xf32>
    %67 = arith.addf %66, %64 : vector<8x2xf32>
    %cst_17 = arith.constant -1.000000e+30 : f32
    %68 = vector.broadcast %cst_17 : f32 to vector<8x2xf32>
    %69 = arith.select %2, %67, %68 : vector<8x2xi1>, vector<8x2xf32>
    %c1_i32_18 = arith.constant 1 : i32
    %70 = tpu.dynamic_rotate %69 by %c1_i32_18 dim 0 : vector<8x2xf32>, i32 -> vector<8x2xf32>
    %c2_i32_19 = arith.constant 2 : i32
    %71 = tpu.dynamic_rotate %69 by %c2_i32_19 dim 0 : vector<8x2xf32>, i32 -> vector<8x2xf32>
    %72 = arith.addf %71, %3 : vector<8x2xf32>
    %73 = arith.maximumf %69, %70 : vector<8x2xf32>
    %74 = arith.maximumf %73, %72 : vector<8x2xf32>
    %75 = arith.subf %69, %74 : vector<8x2xf32>
    %76 = math.exp %75 : vector<8x2xf32>
    %77 = arith.subf %70, %74 : vector<8x2xf32>
    %78 = math.exp %77 : vector<8x2xf32>
    %79 = arith.addf %76, %78 : vector<8x2xf32>
    %80 = arith.subf %72, %74 : vector<8x2xf32>
    %81 = math.exp %80 : vector<8x2xf32>
    %82 = arith.addf %79, %81 : vector<8x2xf32>
    %83 = math.log %82 : vector<8x2xf32>
    %84 = arith.addf %74, %83 : vector<8x2xf32>
    %c4 = arith.constant 4 : index
    %c0_20 = arith.constant 0 : index
    %c0_21 = arith.constant 0 : index
    %85 = vector.load %arg1[%c4, %c0_20, %c0_21] : memref<16x8x2xf32, #tpu.memory_space<vmem>>, vector<1x8x2xf32>
    %86 = vector.shape_cast %85 : vector<1x8x2xf32> to vector<8x2xf32>
    %87 = arith.addf %86, %84 : vector<8x2xf32>
    %cst_22 = arith.constant -1.000000e+30 : f32
    %88 = vector.broadcast %cst_22 : f32 to vector<8x2xf32>
    %89 = arith.select %2, %87, %88 : vector<8x2xi1>, vector<8x2xf32>
    %c1_i32_23 = arith.constant 1 : i32
    %90 = tpu.dynamic_rotate %89 by %c1_i32_23 dim 0 : vector<8x2xf32>, i32 -> vector<8x2xf32>
    %c2_i32_24 = arith.constant 2 : i32
    %91 = tpu.dynamic_rotate %89 by %c2_i32_24 dim 0 : vector<8x2xf32>, i32 -> vector<8x2xf32>
    %92 = arith.addf %91, %3 : vector<8x2xf32>
    %93 = arith.maximumf %89, %90 : vector<8x2xf32>
    %94 = arith.maximumf %93, %92 : vector<8x2xf32>
    %95 = arith.subf %89, %94 : vector<8x2xf32>
    %96 = math.exp %95 : vector<8x2xf32>
    %97 = arith.subf %90, %94 : vector<8x2xf32>
    %98 = math.exp %97 : vector<8x2xf32>
    %99 = arith.addf %96, %98 : vector<8x2xf32>
    %100 = arith.subf %92, %94 : vector<8x2xf32>
    %101 = math.exp %100 : vector<8x2xf32>
    %102 = arith.addf %99, %101 : vector<8x2xf32>
    %103 = math.log %102 : vector<8x2xf32>
    %104 = arith.addf %94, %103 : vector<8x2xf32>
    %c5 = arith.constant 5 : index
    %c0_25 = arith.constant 0 : index
    %c0_26 = arith.constant 0 : index
    %105 = vector.load %arg1[%c5, %c0_25, %c0_26] : memref<16x8x2xf32, #tpu.memory_space<vmem>>, vector<1x8x2xf32>
    %106 = vector.shape_cast %105 : vector<1x8x2xf32> to vector<8x2xf32>
    %107 = arith.addf %106, %104 : vector<8x2xf32>
    %cst_27 = arith.constant -1.000000e+30 : f32
    %108 = vector.broadcast %cst_27 : f32 to vector<8x2xf32>
    %109 = arith.select %2, %107, %108 : vector<8x2xi1>, vector<8x2xf32>
    %c1_i32_28 = arith.constant 1 : i32
    %110 = tpu.dynamic_rotate %109 by %c1_i32_28 dim 0 : vector<8x2xf32>, i32 -> vector<8x2xf32>
    %c2_i32_29 = arith.constant 2 : i32
    %111 = tpu.dynamic_rotate %109 by %c2_i32_29 dim 0 : vector<8x2xf32>, i32 -> vector<8x2xf32>
    %112 = arith.addf %111, %3 : vector<8x2xf32>
    %113 = arith.maximumf %109, %110 : vector<8x2xf32>
    %114 = arith.maximumf %113, %112 : vector<8x2xf32>
    %115 = arith.subf %109, %114 : vector<8x2xf32>
    %116 = math.exp %115 : vector<8x2xf32>
    %117 = arith.subf %110, %114 : vector<8x2xf32>
    %118 = math.exp %117 : vector<8x2xf32>
    %119 = arith.addf %116, %118 : vector<8x2xf32>
    %120 = arith.subf %112, %114 : vector<8x2xf32>
    %121 = math.exp %120 : vector<8x2xf32>
    %122 = arith.addf %119, %121 : vector<8x2xf32>
    %123 = math.log %122 : vector<8x2xf32>
    %124 = arith.addf %114, %123 : vector<8x2xf32>
    %c6 = arith.constant 6 : index
    %c0_30 = arith.constant 0 : index
    %c0_31 = arith.constant 0 : index
    %125 = vector.load %arg1[%c6, %c0_30, %c0_31] : memref<16x8x2xf32, #tpu.memory_space<vmem>>, vector<1x8x2xf32>
    %126 = vector.shape_cast %125 : vector<1x8x2xf32> to vector<8x2xf32>
    %127 = arith.addf %126, %124 : vector<8x2xf32>
    %cst_32 = arith.constant -1.000000e+30 : f32
    %128 = vector.broadcast %cst_32 : f32 to vector<8x2xf32>
    %129 = arith.select %2, %127, %128 : vector<8x2xi1>, vector<8x2xf32>
    %c1_i32_33 = arith.constant 1 : i32
    %130 = tpu.dynamic_rotate %129 by %c1_i32_33 dim 0 : vector<8x2xf32>, i32 -> vector<8x2xf32>
    %c2_i32_34 = arith.constant 2 : i32
    %131 = tpu.dynamic_rotate %129 by %c2_i32_34 dim 0 : vector<8x2xf32>, i32 -> vector<8x2xf32>
    %132 = arith.addf %131, %3 : vector<8x2xf32>
    %133 = arith.maximumf %129, %130 : vector<8x2xf32>
    %134 = arith.maximumf %133, %132 : vector<8x2xf32>
    %135 = arith.subf %129, %134 : vector<8x2xf32>
    %136 = math.exp %135 : vector<8x2xf32>
    %137 = arith.subf %130, %134 : vector<8x2xf32>
    %138 = math.exp %137 : vector<8x2xf32>
    %139 = arith.addf %136, %138 : vector<8x2xf32>
    %140 = arith.subf %132, %134 : vector<8x2xf32>
    %141 = math.exp %140 : vector<8x2xf32>
    %142 = arith.addf %139, %141 : vector<8x2xf32>
    %143 = math.log %142 : vector<8x2xf32>
    %144 = arith.addf %134, %143 : vector<8x2xf32>
    %c7 = arith.constant 7 : index
    %c0_35 = arith.constant 0 : index
    %c0_36 = arith.constant 0 : index
    %145 = vector.load %arg1[%c7, %c0_35, %c0_36] : memref<16x8x2xf32, #tpu.memory_space<vmem>>, vector<1x8x2xf32>
    %146 = vector.shape_cast %145 : vector<1x8x2xf32> to vector<8x2xf32>
    %147 = arith.addf %146, %144 : vector<8x2xf32>
    %cst_37 = arith.constant -1.000000e+30 : f32
    %148 = vector.broadcast %cst_37 : f32 to vector<8x2xf32>
    %149 = arith.select %2, %147, %148 : vector<8x2xi1>, vector<8x2xf32>
    %c1_i32_38 = arith.constant 1 : i32
    %150 = tpu.dynamic_rotate %149 by %c1_i32_38 dim 0 : vector<8x2xf32>, i32 -> vector<8x2xf32>
    %c2_i32_39 = arith.constant 2 : i32
    %151 = tpu.dynamic_rotate %149 by %c2_i32_39 dim 0 : vector<8x2xf32>, i32 -> vector<8x2xf32>
    %152 = arith.addf %151, %3 : vector<8x2xf32>
    %153 = arith.maximumf %149, %150 : vector<8x2xf32>
    %154 = arith.maximumf %153, %152 : vector<8x2xf32>
    %155 = arith.subf %149, %154 : vector<8x2xf32>
    %156 = math.exp %155 : vector<8x2xf32>
    %157 = arith.subf %150, %154 : vector<8x2xf32>
    %158 = math.exp %157 : vector<8x2xf32>
    %159 = arith.addf %156, %158 : vector<8x2xf32>
    %160 = arith.subf %152, %154 : vector<8x2xf32>
    %161 = math.exp %160 : vector<8x2xf32>
    %162 = arith.addf %159, %161 : vector<8x2xf32>
    %163 = math.log %162 : vector<8x2xf32>
    %164 = arith.addf %154, %163 : vector<8x2xf32>
    %c8 = arith.constant 8 : index
    %c0_40 = arith.constant 0 : index
    %c0_41 = arith.constant 0 : index
    %165 = vector.load %arg1[%c8, %c0_40, %c0_41] : memref<16x8x2xf32, #tpu.memory_space<vmem>>, vector<1x8x2xf32>
    %166 = vector.shape_cast %165 : vector<1x8x2xf32> to vector<8x2xf32>
    %167 = arith.addf %166, %164 : vector<8x2xf32>
    %cst_42 = arith.constant -1.000000e+30 : f32
    %168 = vector.broadcast %cst_42 : f32 to vector<8x2xf32>
    %169 = arith.select %2, %167, %168 : vector<8x2xi1>, vector<8x2xf32>
    %c1_i32_43 = arith.constant 1 : i32
    %170 = tpu.dynamic_rotate %169 by %c1_i32_43 dim 0 : vector<8x2xf32>, i32 -> vector<8x2xf32>
    %c2_i32_44 = arith.constant 2 : i32
    %171 = tpu.dynamic_rotate %169 by %c2_i32_44 dim 0 : vector<8x2xf32>, i32 -> vector<8x2xf32>
    %172 = arith.addf %171, %3 : vector<8x2xf32>
    %173 = arith.maximumf %169, %170 : vector<8x2xf32>
    %174 = arith.maximumf %173, %172 : vector<8x2xf32>
    %175 = arith.subf %169, %174 : vector<8x2xf32>
    %176 = math.exp %175 : vector<8x2xf32>
    %177 = arith.subf %170, %174 : vector<8x2xf32>
    %178 = math.exp %177 : vector<8x2xf32>
    %179 = arith.addf %176, %178 : vector<8x2xf32>
    %180 = arith.subf %172, %174 : vector<8x2xf32>
    %181 = math.exp %180 : vector<8x2xf32>
    %182 = arith.addf %179, %181 : vector<8x2xf32>
    %183 = math.log %182 : vector<8x2xf32>
    %184 = arith.addf %174, %183 : vector<8x2xf32>
    %c9 = arith.constant 9 : index
    %c0_45 = arith.constant 0 : index
    %c0_46 = arith.constant 0 : index
    %185 = vector.load %arg1[%c9, %c0_45, %c0_46] : memref<16x8x2xf32, #tpu.memory_space<vmem>>, vector<1x8x2xf32>
    %186 = vector.shape_cast %185 : vector<1x8x2xf32> to vector<8x2xf32>
    %187 = arith.addf %186, %184 : vector<8x2xf32>
    %cst_47 = arith.constant -1.000000e+30 : f32
    %188 = vector.broadcast %cst_47 : f32 to vector<8x2xf32>
    %189 = arith.select %2, %187, %188 : vector<8x2xi1>, vector<8x2xf32>
    %c1_i32_48 = arith.constant 1 : i32
    %190 = tpu.dynamic_rotate %189 by %c1_i32_48 dim 0 : vector<8x2xf32>, i32 -> vector<8x2xf32>
    %c2_i32_49 = arith.constant 2 : i32
    %191 = tpu.dynamic_rotate %189 by %c2_i32_49 dim 0 : vector<8x2xf32>, i32 -> vector<8x2xf32>
    %192 = arith.addf %191, %3 : vector<8x2xf32>
    %193 = arith.maximumf %189, %190 : vector<8x2xf32>
    %194 = arith.maximumf %193, %192 : vector<8x2xf32>
    %195 = arith.subf %189, %194 : vector<8x2xf32>
    %196 = math.exp %195 : vector<8x2xf32>
    %197 = arith.subf %190, %194 : vector<8x2xf32>
    %198 = math.exp %197 : vector<8x2xf32>
    %199 = arith.addf %196, %198 : vector<8x2xf32>
    %200 = arith.subf %192, %194 : vector<8x2xf32>
    %201 = math.exp %200 : vector<8x2xf32>
    %202 = arith.addf %199, %201 : vector<8x2xf32>
    %203 = math.log %202 : vector<8x2xf32>
    %204 = arith.addf %194, %203 : vector<8x2xf32>
    %c10 = arith.constant 10 : index
    %c0_50 = arith.constant 0 : index
    %c0_51 = arith.constant 0 : index
    %205 = vector.load %arg1[%c10, %c0_50, %c0_51] : memref<16x8x2xf32, #tpu.memory_space<vmem>>, vector<1x8x2xf32>
    %206 = vector.shape_cast %205 : vector<1x8x2xf32> to vector<8x2xf32>
    %207 = arith.addf %206, %204 : vector<8x2xf32>
    %cst_52 = arith.constant -1.000000e+30 : f32
    %208 = vector.broadcast %cst_52 : f32 to vector<8x2xf32>
    %209 = arith.select %2, %207, %208 : vector<8x2xi1>, vector<8x2xf32>
    %c1_i32_53 = arith.constant 1 : i32
    %210 = tpu.dynamic_rotate %209 by %c1_i32_53 dim 0 : vector<8x2xf32>, i32 -> vector<8x2xf32>
    %c2_i32_54 = arith.constant 2 : i32
    %211 = tpu.dynamic_rotate %209 by %c2_i32_54 dim 0 : vector<8x2xf32>, i32 -> vector<8x2xf32>
    %212 = arith.addf %211, %3 : vector<8x2xf32>
    %213 = arith.maximumf %209, %210 : vector<8x2xf32>
    %214 = arith.maximumf %213, %212 : vector<8x2xf32>
    %215 = arith.subf %209, %214 : vector<8x2xf32>
    %216 = math.exp %215 : vector<8x2xf32>
    %217 = arith.subf %210, %214 : vector<8x2xf32>
    %218 = math.exp %217 : vector<8x2xf32>
    %219 = arith.addf %216, %218 : vector<8x2xf32>
    %220 = arith.subf %212, %214 : vector<8x2xf32>
    %221 = math.exp %220 : vector<8x2xf32>
    %222 = arith.addf %219, %221 : vector<8x2xf32>
    %223 = math.log %222 : vector<8x2xf32>
    %224 = arith.addf %214, %223 : vector<8x2xf32>
    %c11 = arith.constant 11 : index
    %c0_55 = arith.constant 0 : index
    %c0_56 = arith.constant 0 : index
    %225 = vector.load %arg1[%c11, %c0_55, %c0_56] : memref<16x8x2xf32, #tpu.memory_space<vmem>>, vector<1x8x2xf32>
    %226 = vector.shape_cast %225 : vector<1x8x2xf32> to vector<8x2xf32>
    %227 = arith.addf %226, %224 : vector<8x2xf32>
    %cst_57 = arith.constant -1.000000e+30 : f32
    %228 = vector.broadcast %cst_57 : f32 to vector<8x2xf32>
    %229 = arith.select %2, %227, %228 : vector<8x2xi1>, vector<8x2xf32>
    %c1_i32_58 = arith.constant 1 : i32
    %230 = tpu.dynamic_rotate %229 by %c1_i32_58 dim 0 : vector<8x2xf32>, i32 -> vector<8x2xf32>
    %c2_i32_59 = arith.constant 2 : i32
    %231 = tpu.dynamic_rotate %229 by %c2_i32_59 dim 0 : vector<8x2xf32>, i32 -> vector<8x2xf32>
    %232 = arith.addf %231, %3 : vector<8x2xf32>
    %233 = arith.maximumf %229, %230 : vector<8x2xf32>
    %234 = arith.maximumf %233, %232 : vector<8x2xf32>
    %235 = arith.subf %229, %234 : vector<8x2xf32>
    %236 = math.exp %235 : vector<8x2xf32>
    %237 = arith.subf %230, %234 : vector<8x2xf32>
    %238 = math.exp %237 : vector<8x2xf32>
    %239 = arith.addf %236, %238 : vector<8x2xf32>
    %240 = arith.subf %232, %234 : vector<8x2xf32>
    %241 = math.exp %240 : vector<8x2xf32>
    %242 = arith.addf %239, %241 : vector<8x2xf32>
    %243 = math.log %242 : vector<8x2xf32>
    %244 = arith.addf %234, %243 : vector<8x2xf32>
    %c12 = arith.constant 12 : index
    %c0_60 = arith.constant 0 : index
    %c0_61 = arith.constant 0 : index
    %245 = vector.load %arg1[%c12, %c0_60, %c0_61] : memref<16x8x2xf32, #tpu.memory_space<vmem>>, vector<1x8x2xf32>
    %246 = vector.shape_cast %245 : vector<1x8x2xf32> to vector<8x2xf32>
    %247 = arith.addf %246, %244 : vector<8x2xf32>
    %cst_62 = arith.constant -1.000000e+30 : f32
    %248 = vector.broadcast %cst_62 : f32 to vector<8x2xf32>
    %249 = arith.select %2, %247, %248 : vector<8x2xi1>, vector<8x2xf32>
    %c1_i32_63 = arith.constant 1 : i32
    %250 = tpu.dynamic_rotate %249 by %c1_i32_63 dim 0 : vector<8x2xf32>, i32 -> vector<8x2xf32>
    %c2_i32_64 = arith.constant 2 : i32
    %251 = tpu.dynamic_rotate %249 by %c2_i32_64 dim 0 : vector<8x2xf32>, i32 -> vector<8x2xf32>
    %252 = arith.addf %251, %3 : vector<8x2xf32>
    %253 = arith.maximumf %249, %250 : vector<8x2xf32>
    %254 = arith.maximumf %253, %252 : vector<8x2xf32>
    %255 = arith.subf %249, %254 : vector<8x2xf32>
    %256 = math.exp %255 : vector<8x2xf32>
    %257 = arith.subf %250, %254 : vector<8x2xf32>
    %258 = math.exp %257 : vector<8x2xf32>
    %259 = arith.addf %256, %258 : vector<8x2xf32>
    %260 = arith.subf %252, %254 : vector<8x2xf32>
    %261 = math.exp %260 : vector<8x2xf32>
    %262 = arith.addf %259, %261 : vector<8x2xf32>
    %263 = math.log %262 : vector<8x2xf32>
    %264 = arith.addf %254, %263 : vector<8x2xf32>
    %c13 = arith.constant 13 : index
    %c0_65 = arith.constant 0 : index
    %c0_66 = arith.constant 0 : index
    %265 = vector.load %arg1[%c13, %c0_65, %c0_66] : memref<16x8x2xf32, #tpu.memory_space<vmem>>, vector<1x8x2xf32>
    %266 = vector.shape_cast %265 : vector<1x8x2xf32> to vector<8x2xf32>
    %267 = arith.addf %266, %264 : vector<8x2xf32>
    %cst_67 = arith.constant -1.000000e+30 : f32
    %268 = vector.broadcast %cst_67 : f32 to vector<8x2xf32>
    %269 = arith.select %2, %267, %268 : vector<8x2xi1>, vector<8x2xf32>
    %c1_i32_68 = arith.constant 1 : i32
    %270 = tpu.dynamic_rotate %269 by %c1_i32_68 dim 0 : vector<8x2xf32>, i32 -> vector<8x2xf32>
    %c2_i32_69 = arith.constant 2 : i32
    %271 = tpu.dynamic_rotate %269 by %c2_i32_69 dim 0 : vector<8x2xf32>, i32 -> vector<8x2xf32>
    %272 = arith.addf %271, %3 : vector<8x2xf32>
    %273 = arith.maximumf %269, %270 : vector<8x2xf32>
    %274 = arith.maximumf %273, %272 : vector<8x2xf32>
    %275 = arith.subf %269, %274 : vector<8x2xf32>
    %276 = math.exp %275 : vector<8x2xf32>
    %277 = arith.subf %270, %274 : vector<8x2xf32>
    %278 = math.exp %277 : vector<8x2xf32>
    %279 = arith.addf %276, %278 : vector<8x2xf32>
    %280 = arith.subf %272, %274 : vector<8x2xf32>
    %281 = math.exp %280 : vector<8x2xf32>
    %282 = arith.addf %279, %281 : vector<8x2xf32>
    %283 = math.log %282 : vector<8x2xf32>
    %284 = arith.addf %274, %283 : vector<8x2xf32>
    %c14 = arith.constant 14 : index
    %c0_70 = arith.constant 0 : index
    %c0_71 = arith.constant 0 : index
    %285 = vector.load %arg1[%c14, %c0_70, %c0_71] : memref<16x8x2xf32, #tpu.memory_space<vmem>>, vector<1x8x2xf32>
    %286 = vector.shape_cast %285 : vector<1x8x2xf32> to vector<8x2xf32>
    %287 = arith.addf %286, %284 : vector<8x2xf32>
    %cst_72 = arith.constant -1.000000e+30 : f32
    %288 = vector.broadcast %cst_72 : f32 to vector<8x2xf32>
    %289 = arith.select %2, %287, %288 : vector<8x2xi1>, vector<8x2xf32>
    %c1_i32_73 = arith.constant 1 : i32
    %290 = tpu.dynamic_rotate %289 by %c1_i32_73 dim 0 : vector<8x2xf32>, i32 -> vector<8x2xf32>
    %c2_i32_74 = arith.constant 2 : i32
    %291 = tpu.dynamic_rotate %289 by %c2_i32_74 dim 0 : vector<8x2xf32>, i32 -> vector<8x2xf32>
    %292 = arith.addf %291, %3 : vector<8x2xf32>
    %293 = arith.maximumf %289, %290 : vector<8x2xf32>
    %294 = arith.maximumf %293, %292 : vector<8x2xf32>
    %295 = arith.subf %289, %294 : vector<8x2xf32>
    %296 = math.exp %295 : vector<8x2xf32>
    %297 = arith.subf %290, %294 : vector<8x2xf32>
    %298 = math.exp %297 : vector<8x2xf32>
    %299 = arith.addf %296, %298 : vector<8x2xf32>
    %300 = arith.subf %292, %294 : vector<8x2xf32>
    %301 = math.exp %300 : vector<8x2xf32>
    %302 = arith.addf %299, %301 : vector<8x2xf32>
    %303 = math.log %302 : vector<8x2xf32>
    %304 = arith.addf %294, %303 : vector<8x2xf32>
    %c15 = arith.constant 15 : index
    %c0_75 = arith.constant 0 : index
    %c0_76 = arith.constant 0 : index
    %305 = vector.load %arg1[%c15, %c0_75, %c0_76] : memref<16x8x2xf32, #tpu.memory_space<vmem>>, vector<1x8x2xf32>
    %306 = vector.shape_cast %305 : vector<1x8x2xf32> to vector<8x2xf32>
    %307 = arith.addf %306, %304 : vector<8x2xf32>
    %cst_77 = arith.constant -1.000000e+30 : f32
    %308 = vector.broadcast %cst_77 : f32 to vector<8x2xf32>
    %309 = arith.select %2, %307, %308 : vector<8x2xi1>, vector<8x2xf32>
    %310 = vector.extract_strided_slice %309 {offsets = [4, 0], sizes = [1, 2], strides = [1, 1]} : vector<8x2xf32> to vector<1x2xf32>
    %311 = vector.extract_strided_slice %309 {offsets = [3, 0], sizes = [1, 2], strides = [1, 1]} : vector<8x2xf32> to vector<1x2xf32>
    %312 = arith.maximumf %310, %311 : vector<1x2xf32>
    %313 = arith.subf %310, %312 : vector<1x2xf32>
    %314 = math.exp %313 : vector<1x2xf32>
    %315 = arith.subf %311, %312 : vector<1x2xf32>
    %316 = math.exp %315 : vector<1x2xf32>
    %317 = arith.addf %314, %316 : vector<1x2xf32>
    %318 = math.log %317 : vector<1x2xf32>
    %319 = arith.addf %312, %318 : vector<1x2xf32>
    %cst_78 = arith.constant 0.000000e+00 : f32
    %320 = vector.broadcast %cst_78 : f32 to vector<1x2xf32>
    %321 = arith.subf %320, %319 : vector<1x2xf32>
    %c0_79 = arith.constant 0 : index
    %c0_80 = arith.constant 0 : index
    %322 = vector.load %arg3[%c0_79, %c0_80] : memref<1x2xf32, #tpu.memory_space<vmem>>, vector<1x2xf32>
    tpu.vector_store %arg3[%c0_79, %c0_80], %321 {strides = array<i32>} : memref<1x2xf32, #tpu.memory_space<vmem>>, vector<1x2xf32>,
    return
  }
  func.func @transform_0(%arg0: i32) -> (i32, i32, i32) {
    %c0_i32 = arith.constant 0 : i32
    %c0_i32_0 = arith.constant 0 : i32
    %c0_i32_1 = arith.constant 0 : i32
    return %c0_i32, %c0_i32_0, %arg0 : i32, i32, i32
  }
  func.func @transform_1(%arg0: i32) -> (i32, i32) {
    %c0_i32 = arith.constant 0 : i32
    %c0_i32_0 = arith.constant 0 : i32
    return %c0_i32, %arg0 : i32, i32
  }
  func.func @transform_2(%arg0: i32) -> (i32, i32) {
    %c0_i32 = arith.constant 0 : i32
    %c0_i32_0 = arith.constant 0 : i32
    return %c0_i32, %arg0 : i32, i32
  }
}

</mosaic_0001>

<bundles_post_ra>
// kernel: _ctc_loss_impl.1
= control target key start
LH: loop header
LB: loop body
LE: loop exit
PB: predicated region body
PF: predicated region fallthrough
CT: control target
= control target key end

     0   :  { %v11_v0 = vlaneseq  ;;  %vm384_vm2 = vcmask 12292   ;;  %s651_s0 = inlined_call_operand.vmem [shape: f32[16,8,2], index: 0, kind: input, shape index: {}]   ;;  %s652_s1 = inlined_call_operand.vmem [shape: f32[8,2], index: 1, kind: input, shape index: {}]   ;;  %s653_s2 = inlined_call_operand.vmem [shape: f32[1,2], index: 2, kind: output, shape index: {}]  }
   0x1   :  { %v16_v2 = vld [vmem:[%s651_s0] sm:$0xff]  ;;  %v390_v23 = vld [vmem:[%s651_s0 + $0x8] sm:$0xff]  ;;  %v391_v45 = vld [vmem:[%s651_s0 + $0x10] sm:$0xff] }
   0x2   :  { %v546_v1 = vshrl.u32 %v11_v0, 7  ;;  %v555_v3 = vld [vmem:[%s652_s1] sm:$0xff] }
   0x4   :  { %vm15_vm0 = vcmp.le.s32.totalorder %v546_v1, 1  ;;  %vm13_vm1 = vcmp.lt.s32.totalorder %v546_v1, 5 }
   0x5   :  { %v17_v4 = vsel %vm15_vm0, %v16_v2, -1e+30 }
   0x6   :  { %v18_v5 = vrot.slane %v17_v4, 7  ;;  %v19_v6 = vrot.slane %v17_v4, 6 }
   0x8   :  { %v20_v7 = vadd.f32 %v19_v6, %v555_v3  ;;  %v21_v8 = vmax.f32 %v17_v4, %v18_v5 }
   0xa   :  { %v22_v9 = vmax.f32 %v21_v8, %v20_v7 }
   0xc   :  { %v23_v10 = vsub.f32 %v17_v4, %v22_v9  ;;  %v26_v11 = vsub.f32 %v18_v5, %v22_v9  ;;  %v30_v12 = vsub.f32 %v20_v7, %v22_v9  ;;  %v392_v5 = vld [vmem:[%s651_s0 + $0x18] sm:$0xff] }
   0xe   :  { %v24_v13 = vmul.f32 1.442695, %v23_v10  ;;  %v27_v14 = vmul.f32 1.442695, %v26_v11  ;;  %v31_v15 = vmul.f32 1.442695, %v30_v12 }
  0x10   :  { %405 = vpow2.f32 %v24_v13 }
  0x11   :  { %407 = vpow2.f32 %v27_v14 }
  0x12   :  { %409 = vpow2.f32 %v31_v15 }
  0x1a   :  { %v406_v16 = vpop.eup %405 }
  0x1b   :  { %v408_v17 = vpop.eup %407 }
  0x1c   :  { %v410_v18 = vpop.eup %409  ;;  %v29_v19 = vadd.f32 %v408_v17, %v406_v16 }
  0x1e   :  { %v33_v20 = vadd.f32 %v410_v18, %v29_v19 }
  0x20   :  { %411 = vlog2.f32 %v33_v20 }
  0x2a   :  { %v412_v21 = vpop.eup %411 }
  0x2b   :  { %v35_v22 = vmul.f32 0.6931472, %v412_v21 }
  0x2d   :  { %v36_v24 = vadd.f32 %v35_v22, %v22_v9 }
  0x2f   :  { %v39_v25 = vadd.f32 %v390_v23, %v36_v24 }
  0x31   :  { %v40_v26 = vsel %vm13_vm1, %v39_v25, -1e+30 }
  0x32   :  { %v41_v27 = vrot.slane %v40_v26, 7  ;;  %v42_v28 = vrot.slane %v40_v26, 6 }
  0x34   :  { %v43_v29 = vadd.f32 %v42_v28, %v555_v3  ;;  %v44_v30 = vmax.f32 %v40_v26, %v41_v27 }
  0x36   :  { %v45_v31 = vmax.f32 %v44_v30, %v43_v29 }
  0x38   :  { %v46_v32 = vsub.f32 %v40_v26, %v45_v31  ;;  %v49_v33 = vsub.f32 %v41_v27, %v45_v31  ;;  %v53_v34 = vsub.f32 %v43_v29, %v45_v31  ;;  %v393_v27 = vld [vmem:[%s651_s0 + $0x20] sm:$0xff] }
  0x3a   :  { %v47_v35 = vmul.f32 1.442695, %v46_v32  ;;  %v50_v36 = vmul.f32 1.442695, %v49_v33  ;;  %v54_v37 = vmul.f32 1.442695, %v53_v34 }
  0x3c   :  { %413 = vpow2.f32 %v47_v35 }
  0x3d   :  { %415 = vpow2.f32 %v50_v36 }
  0x3e   :  { %417 = vpow2.f32 %v54_v37 }
  0x46   :  { %v414_v38 = vpop.eup %413 }
  0x47   :  { %v416_v39 = vpop.eup %415 }
  0x48   :  { %v418_v40 = vpop.eup %417  ;;  %v52_v41 = vadd.f32 %v416_v39, %v414_v38 }
  0x4a   :  { %v56_v42 = vadd.f32 %v418_v40, %v52_v41 }
  0x4c   :  { %419 = vlog2.f32 %v56_v42 }
  0x56   :  { %v420_v43 = vpop.eup %419 }
  0x57   :  { %v58_v44 = vmul.f32 0.6931472, %v420_v43 }
  0x59   :  { %v59_v46 = vadd.f32 %v58_v44, %v45_v31 }
  0x5b   :  { %v62_v47 = vadd.f32 %v391_v45, %v59_v46 }
  0x5d   :  { %v63_v48 = vsel %vm13_vm1, %v62_v47, -1e+30 }
  0x5e   :  { %v64_v49 = vrot.slane %v63_v48, 7  ;;  %v65_v50 = vrot.slane %v63_v48, 6 }
  0x60   :  { %v66_v51 = vadd.f32 %v65_v50, %v555_v3  ;;  %v67_v52 = vmax.f32 %v63_v48, %v64_v49 }
  0x62   :  { %v68_v53 = vmax.f32 %v67_v52, %v66_v51 }
  0x64   :  { %v69_v54 = vsub.f32 %v63_v48, %v68_v53  ;;  %v72_v55 = vsub.f32 %v64_v49, %v68_v53  ;;  %v76_v56 = vsub.f32 %v66_v51, %v68_v53  ;;  %v394_v49 = vld [vmem:[%s651_s0 + $0x28] sm:$0xff] }
  0x66   :  { %v70_v57 = vmul.f32 1.442695, %v69_v54  ;;  %v73_v58 = vmul.f32 1.442695, %v72_v55  ;;  %v77_v59 = vmul.f32 1.442695, %v76_v56 }
  0x68   :  { %421 = vpow2.f32 %v70_v57 }
  0x69   :  { %423 = vpow2.f32 %v73_v58 }
  0x6a   :  { %425 = vpow2.f32 %v77_v59 }
  0x72   :  { %v422_v60 = vpop.eup %421 }
  0x73   :  { %v424_v61 = vpop.eup %423 }
  0x74   :  { %v426_v62 = vpop.eup %425  ;;  %v75_v63 = vadd.f32 %v424_v61, %v422_v60 }
  0x76   :  { %v79_v0 = vadd.f32 %v426_v62, %v75_v63 }
  0x78   :  { %427 = vlog2.f32 %v79_v0 }
  0x82   :  { %v428_v2 = vpop.eup %427 }
  0x83   :  { %v81_v4 = vmul.f32 0.6931472, %v428_v2 }
  0x85   :  { %v82_v6 = vadd.f32 %v81_v4, %v68_v53 }
  0x87   :  { %v85_v7 = vadd.f32 %v392_v5, %v82_v6 }
  0x89   :  { %v86_v8 = vsel %vm13_vm1, %v85_v7, -1e+30 }
  0x8a   :  { %v87_v9 = vrot.slane %v86_v8, 7  ;;  %v88_v10 = vrot.slane %v86_v8, 6 }
  0x8c   :  { %v89_v11 = vadd.f32 %v88_v10, %v555_v3  ;;  %v90_v12 = vmax.f32 %v86_v8, %v87_v9 }
  0x8e   :  { %v91_v13 = vmax.f32 %v90_v12, %v89_v11 }
  0x90   :  { %v92_v14 = vsub.f32 %v86_v8, %v91_v13  ;;  %v95_v15 = vsub.f32 %v87_v9, %v91_v13  ;;  %v99_v16 = vsub.f32 %v89_v11, %v91_v13  ;;  %v395_v9 = vld [vmem:[%s651_s0 + $0x30] sm:$0xff] }
  0x92   :  { %v93_v17 = vmul.f32 1.442695, %v92_v14  ;;  %v96_v18 = vmul.f32 1.442695, %v95_v15  ;;  %v100_v19 = vmul.f32 1.442695, %v99_v16 }
  0x94   :  { %429 = vpow2.f32 %v93_v17 }
  0x95   :  { %431 = vpow2.f32 %v96_v18 }
  0x96   :  { %433 = vpow2.f32 %v100_v19 }
  0x9e   :  { %v430_v20 = vpop.eup %429 }
  0x9f   :  { %v432_v21 = vpop.eup %431 }
  0xa0   :  { %v434_v22 = vpop.eup %433  ;;  %v98_v23 = vadd.f32 %v432_v21, %v430_v20 }
  0xa2   :  { %v102_v24 = vadd.f32 %v434_v22, %v98_v23 }
  0xa4   :  { %435 = vlog2.f32 %v102_v24 }
  0xae   :  { %v436_v25 = vpop.eup %435 }
  0xaf   :  { %v104_v26 = vmul.f32 0.6931472, %v436_v25 }
  0xb1   :  { %v105_v28 = vadd.f32 %v104_v26, %v91_v13 }
  0xb3   :  { %v108_v29 = vadd.f32 %v393_v27, %v105_v28 }
  0xb5   :  { %v109_v30 = vsel %vm13_vm1, %v108_v29, -1e+30 }
  0xb6   :  { %v110_v31 = vrot.slane %v109_v30, 7  ;;  %v111_v32 = vrot.slane %v109_v30, 6 }
  0xb8   :  { %v112_v33 = vadd.f32 %v111_v32, %v555_v3  ;;  %v113_v34 = vmax.f32 %v109_v30, %v110_v31 }
  0xba   :  { %v114_v35 = vmax.f32 %v113_v34, %v112_v33 }
  0xbc   :  { %v115_v36 = vsub.f32 %v109_v30, %v114_v35  ;;  %v118_v37 = vsub.f32 %v110_v31, %v114_v35  ;;  %v122_v38 = vsub.f32 %v112_v33, %v114_v35  ;;  %v396_v31 = vld [vmem:[%s651_s0 + $0x38] sm:$0xff] }
  0xbe   :  { %v116_v39 = vmul.f32 1.442695, %v115_v36  ;;  %v119_v40 = vmul.f32 1.442695, %v118_v37  ;;  %v123_v41 = vmul.f32 1.442695, %v122_v38 }
  0xc0   :  { %437 = vpow2.f32 %v116_v39 }
  0xc1   :  { %439 = vpow2.f32 %v119_v40 }
  0xc2   :  { %441 = vpow2.f32 %v123_v41 }
  0xca   :  { %v438_v42 = vpop.eup %437 }
  0xcb   :  { %v440_v43 = vpop.eup %439 }
  0xcc   :  { %v442_v44 = vpop.eup %441  ;;  %v121_v45 = vadd.f32 %v440_v43, %v438_v42 }
  0xce   :  { %v125_v46 = vadd.f32 %v442_v44, %v121_v45 }
  0xd0   :  { %443 = vlog2.f32 %v125_v46 }
  0xda   :  { %v444_v47 = vpop.eup %443 }
  0xdb   :  { %v127_v48 = vmul.f32 0.6931472, %v444_v47 }
  0xdd   :  { %v128_v50 = vadd.f32 %v127_v48, %v114_v35 }
  0xdf   :  { %v131_v51 = vadd.f32 %v394_v49, %v128_v50 }
  0xe1   :  { %v132_v52 = vsel %vm13_vm1, %v131_v51, -1e+30 }
  0xe2   :  { %v133_v53 = vrot.slane %v132_v52, 7  ;;  %v134_v54 = vrot.slane %v132_v52, 6 }
  0xe4   :  { %v135_v55 = vadd.f32 %v134_v54, %v555_v3  ;;  %v136_v56 = vmax.f32 %v132_v52, %v133_v53 }
  0xe6   :  { %v137_v57 = vmax.f32 %v136_v56, %v135_v55 }
  0xe8   :  { %v138_v58 = vsub.f32 %v132_v52, %v137_v57  ;;  %v141_v59 = vsub.f32 %v133_v53, %v137_v57  ;;  %v145_v60 = vsub.f32 %v135_v55, %v137_v57  ;;  %v397_v53 = vld [vmem:[%s651_s0 + $0x40] sm:$0xff] }
  0xea   :  { %v139_v61 = vmul.f32 1.442695, %v138_v58  ;;  %v142_v62 = vmul.f32 1.442695, %v141_v59  ;;  %v146_v63 = vmul.f32 1.442695, %v145_v60 }
  0xec   :  { %445 = vpow2.f32 %v139_v61 }
  0xed   :  { %447 = vpow2.f32 %v142_v62 }
  0xee   :  { %449 = vpow2.f32 %v146_v63 }
  0xf6   :  { %v446_v0 = vpop.eup %445 }
  0xf7   :  { %v448_v2 = vpop.eup %447 }
  0xf8   :  { %v450_v4 = vpop.eup %449  ;;  %v144_v5 = vadd.f32 %v448_v2, %v446_v0 }
  0xfa   :  { %v148_v6 = vadd.f32 %v450_v4, %v144_v5 }
  0xfc   :  { %451 = vlog2.f32 %v148_v6 }
 0x106   :  { %v452_v7 = vpop.eup %451 }
 0x107   :  { %v150_v8 = vmul.f32 0.6931472, %v452_v7 }
 0x109   :  { %v151_v10 = vadd.f32 %v150_v8, %v137_v57 }
 0x10b   :  { %v154_v11 = vadd.f32 %v395_v9, %v151_v10 }
 0x10d   :  { %v155_v12 = vsel %vm13_vm1, %v154_v11, -1e+30 }
 0x10e   :  { %v156_v13 = vrot.slane %v155_v12, 7  ;;  %v157_v14 = vrot.slane %v155_v12, 6 }
 0x110   :  { %v158_v15 = vadd.f32 %v157_v14, %v555_v3  ;;  %v159_v16 = vmax.f32 %v155_v12, %v156_v13 }
 0x112   :  { %v160_v17 = vmax.f32 %v159_v16, %v158_v15 }
 0x114   :  { %v161_v18 = vsub.f32 %v155_v12, %v160_v17  ;;  %v164_v19 = vsub.f32 %v156_v13, %v160_v17  ;;  %v168_v20 = vsub.f32 %v158_v15, %v160_v17  ;;  %v398_v13 = vld [vmem:[%s651_s0 + $0x48] sm:$0xff] }
 0x116   :  { %v162_v21 = vmul.f32 1.442695, %v161_v18  ;;  %v165_v22 = vmul.f32 1.442695, %v164_v19  ;;  %v169_v23 = vmul.f32 1.442695, %v168_v20 }
 0x118   :  { %453 = vpow2.f32 %v162_v21 }
 0x119   :  { %455 = vpow2.f32 %v165_v22 }
 0x11a   :  { %457 = vpow2.f32 %v169_v23 }
 0x122   :  { %v454_v24 = vpop.eup %453 }
 0x123   :  { %v456_v25 = vpop.eup %455 }
 0x124   :  { %v458_v26 = vpop.eup %457  ;;  %v167_v27 = vadd.f32 %v456_v25, %v454_v24 }
 0x126   :  { %v171_v28 = vadd.f32 %v458_v26, %v167_v27 }
 0x128   :  { %459 = vlog2.f32 %v171_v28 }
 0x132   :  { %v460_v29 = vpop.eup %459 }
 0x133   :  { %v173_v30 = vmul.f32 0.6931472, %v460_v29 }
 0x135   :  { %v174_v32 = vadd.f32 %v173_v30, %v160_v17 }
 0x137   :  { %v177_v33 = vadd.f32 %v396_v31, %v174_v32 }
 0x139   :  { %v178_v34 = vsel %vm13_vm1, %v177_v33, -1e+30 }
 0x13a   :  { %v179_v35 = vrot.slane %v178_v34, 7  ;;  %v180_v36 = vrot.slane %v178_v34, 6 }
 0x13c   :  { %v181_v37 = vadd.f32 %v180_v36, %v555_v3  ;;  %v182_v38 = vmax.f32 %v178_v34, %v179_v35 }
 0x13e   :  { %v183_v39 = vmax.f32 %v182_v38, %v181_v37 }
 0x140   :  { %v184_v40 = vsub.f32 %v178_v34, %v183_v39  ;;  %v187_v41 = vsub.f32 %v179_v35, %v183_v39  ;;  %v191_v42 = vsub.f32 %v181_v37, %v183_v39  ;;  %v399_v35 = vld [vmem:[%s651_s0 + $0x50] sm:$0xff] }
 0x142   :  { %v185_v43 = vmul.f32 1.442695, %v184_v40  ;;  %v188_v44 = vmul.f32 1.442695, %v187_v41  ;;  %v192_v45 = vmul.f32 1.442695, %v191_v42 }
 0x144   :  { %461 = vpow2.f32 %v185_v43 }
 0x145   :  { %463 = vpow2.f32 %v188_v44 }
 0x146   :  { %465 = vpow2.f32 %v192_v45 }
 0x14e   :  { %v462_v46 = vpop.eup %461 }
 0x14f   :  { %v464_v47 = vpop.eup %463 }
 0x150   :  { %v466_v48 = vpop.eup %465  ;;  %v190_v49 = vadd.f32 %v464_v47, %v462_v46 }
 0x152   :  { %v194_v50 = vadd.f32 %v466_v48, %v190_v49 }
 0x154   :  { %467 = vlog2.f32 %v194_v50 }
 0x15e   :  { %v468_v51 = vpop.eup %467 }
 0x15f   :  { %v196_v52 = vmul.f32 0.6931472, %v468_v51 }
 0x161   :  { %v197_v54 = vadd.f32 %v196_v52, %v183_v39 }
 0x163   :  { %v200_v55 = vadd.f32 %v397_v53, %v197_v54 }
 0x165   :  { %v201_v56 = vsel %vm13_vm1, %v200_v55, -1e+30 }
 0x166   :  { %v202_v57 = vrot.slane %v201_v56, 7  ;;  %v203_v58 = vrot.slane %v201_v56, 6 }
 0x168   :  { %v204_v59 = vadd.f32 %v203_v58, %v555_v3  ;;  %v205_v60 = vmax.f32 %v201_v56, %v202_v57 }
 0x16a   :  { %v206_v61 = vmax.f32 %v205_v60, %v204_v59 }
 0x16c   :  { %v207_v62 = vsub.f32 %v201_v56, %v206_v61  ;;  %v210_v63 = vsub.f32 %v202_v57, %v206_v61  ;;  %v214_v0 = vsub.f32 %v204_v59, %v206_v61  ;;  %v400_v57 = vld [vmem:[%s651_s0 + $0x58] sm:$0xff] }
 0x16e   :  { %v208_v2 = vmul.f32 1.442695, %v207_v62  ;;  %v211_v4 = vmul.f32 1.442695, %v210_v63  ;;  %v215_v5 = vmul.f32 1.442695, %v214_v0 }
 0x170   :  { %469 = vpow2.f32 %v208_v2 }
 0x171   :  { %471 = vpow2.f32 %v211_v4 }
 0x172   :  { %473 = vpow2.f32 %v215_v5 }
 0x17a   :  { %v470_v6 = vpop.eup %469 }
 0x17b   :  { %v472_v7 = vpop.eup %471 }
 0x17c   :  { %v474_v8 = vpop.eup %473  ;;  %v213_v9 = vadd.f32 %v472_v7, %v470_v6 }
 0x17e   :  { %v217_v10 = vadd.f32 %v474_v8, %v213_v9 }
 0x180   :  { %475 = vlog2.f32 %v217_v10 }
 0x18a   :  { %v476_v11 = vpop.eup %475 }
 0x18b   :  { %v219_v12 = vmul.f32 0.6931472, %v476_v11 }
 0x18d   :  { %v220_v14 = vadd.f32 %v219_v12, %v206_v61 }
 0x18f   :  { %v223_v15 = vadd.f32 %v398_v13, %v220_v14 }
 0x191   :  { %v224_v16 = vsel %vm13_vm1, %v223_v15, -1e+30 }
 0x192   :  { %v225_v17 = vrot.slane %v224_v16, 7  ;;  %v226_v18 = vrot.slane %v224_v16, 6 }
 0x194   :  { %v227_v19 = vadd.f32 %v226_v18, %v555_v3  ;;  %v228_v20 = vmax.f32 %v224_v16, %v225_v17 }
 0x196   :  { %v229_v21 = vmax.f32 %v228_v20, %v227_v19 }
 0x198   :  { %v230_v22 = vsub.f32 %v224_v16, %v229_v21  ;;  %v233_v23 = vsub.f32 %v225_v17, %v229_v21  ;;  %v237_v24 = vsub.f32 %v227_v19, %v229_v21  ;;  %v401_v17 = vld [vmem:[%s651_s0 + $0x60] sm:$0xff] }
 0x19a   :  { %v231_v25 = vmul.f32 1.442695, %v230_v22  ;;  %v234_v26 = vmul.f32 1.442695, %v233_v23  ;;  %v238_v27 = vmul.f32 1.442695, %v237_v24 }
 0x19c   :  { %477 = vpow2.f32 %v231_v25 }
 0x19d   :  { %479 = vpow2.f32 %v234_v26 }
 0x19e   :  { %481 = vpow2.f32 %v238_v27 }
 0x1a6   :  { %v478_v28 = vpop.eup %477 }
 0x1a7   :  { %v480_v29 = vpop.eup %479 }
 0x1a8   :  { %v482_v30 = vpop.eup %481  ;;  %v236_v31 = vadd.f32 %v480_v29, %v478_v28 }
 0x1aa   :  { %v240_v32 = vadd.f32 %v482_v30, %v236_v31 }
 0x1ac   :  { %483 = vlog2.f32 %v240_v32 }
 0x1b6   :  { %v484_v33 = vpop.eup %483 }
 0x1b7   :  { %v242_v34 = vmul.f32 0.6931472, %v484_v33 }
 0x1b9   :  { %v243_v36 = vadd.f32 %v242_v34, %v229_v21 }
 0x1bb   :  { %v246_v37 = vadd.f32 %v399_v35, %v243_v36 }
 0x1bd   :  { %v247_v38 = vsel %vm13_vm1, %v246_v37, -1e+30 }
 0x1be   :  { %v248_v39 = vrot.slane %v247_v38, 7  ;;  %v249_v40 = vrot.slane %v247_v38, 6 }
 0x1c0   :  { %v250_v41 = vadd.f32 %v249_v40, %v555_v3  ;;  %v251_v42 = vmax.f32 %v247_v38, %v248_v39 }
 0x1c2   :  { %v252_v43 = vmax.f32 %v251_v42, %v250_v41 }
 0x1c4   :  { %v253_v44 = vsub.f32 %v247_v38, %v252_v43  ;;  %v256_v45 = vsub.f32 %v248_v39, %v252_v43  ;;  %v260_v46 = vsub.f32 %v250_v41, %v252_v43  ;;  %v402_v39 = vld [vmem:[%s651_s0 + $0x68] sm:$0xff] }
 0x1c6   :  { %v254_v47 = vmul.f32 1.442695, %v253_v44  ;;  %v257_v48 = vmul.f32 1.442695, %v256_v45  ;;  %v261_v49 = vmul.f32 1.442695, %v260_v46 }
 0x1c8   :  { %485 = vpow2.f32 %v254_v47 }
 0x1c9   :  { %487 = vpow2.f32 %v257_v48 }
 0x1ca   :  { %489 = vpow2.f32 %v261_v49 }
 0x1d2   :  { %v486_v50 = vpop.eup %485 }
 0x1d3   :  { %v488_v51 = vpop.eup %487 }
 0x1d4   :  { %v490_v52 = vpop.eup %489  ;;  %v259_v53 = vadd.f32 %v488_v51, %v486_v50 }
 0x1d6   :  { %v263_v54 = vadd.f32 %v490_v52, %v259_v53 }
 0x1d8   :  { %491 = vlog2.f32 %v263_v54 }
 0x1e2   :  { %v492_v55 = vpop.eup %491 }
 0x1e3   :  { %v265_v56 = vmul.f32 0.6931472, %v492_v55 }
 0x1e5   :  { %v266_v58 = vadd.f32 %v265_v56, %v252_v43 }
 0x1e7   :  { %v269_v59 = vadd.f32 %v400_v57, %v266_v58 }
 0x1e9   :  { %v270_v60 = vsel %vm13_vm1, %v269_v59, -1e+30 }
 0x1ea   :  { %v271_v61 = vrot.slane %v270_v60, 7  ;;  %v272_v62 = vrot.slane %v270_v60, 6 }
 0x1ec   :  { %v273_v63 = vadd.f32 %v272_v62, %v555_v3  ;;  %v274_v0 = vmax.f32 %v270_v60, %v271_v61 }
 0x1ee   :  { %v275_v2 = vmax.f32 %v274_v0, %v273_v63 }
 0x1f0   :  { %v276_v4 = vsub.f32 %v270_v60, %v275_v2  ;;  %v279_v5 = vsub.f32 %v271_v61, %v275_v2  ;;  %v283_v6 = vsub.f32 %v273_v63, %v275_v2  ;;  %v403_v61 = vld [vmem:[%s651_s0 + $0x70] sm:$0xff] }
 0x1f2   :  { %v277_v7 = vmul.f32 1.442695, %v276_v4  ;;  %v280_v8 = vmul.f32 1.442695, %v279_v5  ;;  %v284_v9 = vmul.f32 1.442695, %v283_v6 }
 0x1f4   :  { %493 = vpow2.f32 %v277_v7 }
 0x1f5   :  { %495 = vpow2.f32 %v280_v8 }
 0x1f6   :  { %497 = vpow2.f32 %v284_v9 }
 0x1fe   :  { %v494_v10 = vpop.eup %493 }
 0x1ff   :  { %v496_v11 = vpop.eup %495 }
 0x200   :  { %v498_v12 = vpop.eup %497  ;;  %v282_v13 = vadd.f32 %v496_v11, %v494_v10 }
 0x202   :  { %v286_v14 = vadd.f32 %v498_v12, %v282_v13 }
 0x204   :  { %499 = vlog2.f32 %v286_v14 }
 0x20e   :  { %v500_v15 = vpop.eup %499 }
 0x20f   :  { %v288_v16 = vmul.f32 0.6931472, %v500_v15 }
 0x211   :  { %v289_v18 = vadd.f32 %v288_v16, %v275_v2 }
 0x213   :  { %v292_v19 = vadd.f32 %v401_v17, %v289_v18 }
 0x215   :  { %v293_v20 = vsel %vm13_vm1, %v292_v19, -1e+30 }
 0x216   :  { %v294_v21 = vrot.slane %v293_v20, 7  ;;  %v295_v22 = vrot.slane %v293_v20, 6 }
 0x218   :  { %v296_v23 = vadd.f32 %v295_v22, %v555_v3  ;;  %v297_v24 = vmax.f32 %v293_v20, %v294_v21 }
 0x21a   :  { %v298_v25 = vmax.f32 %v297_v24, %v296_v23 }
 0x21c   :  { %v299_v26 = vsub.f32 %v293_v20, %v298_v25  ;;  %v302_v27 = vsub.f32 %v294_v21, %v298_v25  ;;  %v306_v28 = vsub.f32 %v296_v23, %v298_v25 }
 0x21e   :  { %v300_v29 = vmul.f32 1.442695, %v299_v26  ;;  %v303_v30 = vmul.f32 1.442695, %v302_v27  ;;  %v307_v31 = vmul.f32 1.442695, %v306_v28 }
 0x220   :  { %501 = vpow2.f32 %v300_v29 }
 0x221   :  { %503 = vpow2.f32 %v303_v30 }
 0x222   :  { %505 = vpow2.f32 %v307_v31 }
 0x22a   :  { %v502_v32 = vpop.eup %501 }
 0x22b   :  { %v504_v33 = vpop.eup %503 }
 0x22c   :  { %v506_v34 = vpop.eup %505  ;;  %v305_v35 = vadd.f32 %v504_v33, %v502_v32 }
 0x22e   :  { %v309_v36 = vadd.f32 %v506_v34, %v305_v35 }
 0x230   :  { %507 = vlog2.f32 %v309_v36 }
 0x23a   :  { %v508_v37 = vpop.eup %507 }
 0x23b   :  { %v311_v38 = vmul.f32 0.6931472, %v508_v37 }
 0x23d   :  { %v312_v40 = vadd.f32 %v311_v38, %v298_v25 }
 0x23f   :  { %v315_v41 = vadd.f32 %v402_v39, %v312_v40 }
 0x241   :  { %v316_v42 = vsel %vm13_vm1, %v315_v41, -1e+30 }
 0x242   :  { %v317_v43 = vrot.slane %v316_v42, 7  ;;  %v318_v44 = vrot.slane %v316_v42, 6 }
 0x244   :  { %v319_v45 = vadd.f32 %v318_v44, %v555_v3  ;;  %v320_v46 = vmax.f32 %v316_v42, %v317_v43 }
 0x246   :  { %v321_v47 = vmax.f32 %v320_v46, %v319_v45 }
 0x248   :  { %v322_v48 = vsub.f32 %v316_v42, %v321_v47  ;;  %v325_v49 = vsub.f32 %v317_v43, %v321_v47  ;;  %v329_v50 = vsub.f32 %v319_v45, %v321_v47 }
 0x24a   :  { %v323_v51 = vmul.f32 1.442695, %v322_v48  ;;  %v326_v52 = vmul.f32 1.442695, %v325_v49  ;;  %v330_v53 = vmul.f32 1.442695, %v329_v50 }
 0x24c   :  { %509 = vpow2.f32 %v323_v51 }
 0x24d   :  { %511 = vpow2.f32 %v326_v52 }
 0x24e   :  { %513 = vpow2.f32 %v330_v53 }
 0x256   :  { %v510_v54 = vpop.eup %509 }
 0x257   :  { %v512_v55 = vpop.eup %511 }
 0x258   :  { %v514_v56 = vpop.eup %513  ;;  %v328_v57 = vadd.f32 %v512_v55, %v510_v54 }
 0x25a   :  { %v332_v58 = vadd.f32 %v514_v56, %v328_v57 }
 0x25c   :  { %515 = vlog2.f32 %v332_v58 }
 0x266   :  { %v516_v59 = vpop.eup %515 }
 0x267   :  { %v334_v60 = vmul.f32 0.6931472, %v516_v59 }
 0x269   :  { %v335_v62 = vadd.f32 %v334_v60, %v321_v47 }
 0x26b   :  { %v338_v63 = vadd.f32 %v403_v61, %v335_v62 }
 0x26d   :  { %v339_v0 = vsel %vm13_vm1, %v338_v63, -1e+30 }
 0x26e   :  { %v340_v2 = vrot.slane %v339_v0, 7  ;;  %v341_v4 = vrot.slane %v339_v0, 6 }
 0x270   :  { %v342_v5 = vadd.f32 %v341_v4, %v555_v3  ;;  %v343_v6 = vmax.f32 %v339_v0, %v340_v2  ;;  %v404_v3 = vld [vmem:[%s651_s0 + $0x78] sm:$0xff] }
 0x272   :  { %v344_v7 = vmax.f32 %v343_v6, %v342_v5 }
 0x274   :  { %v345_v8 = vsub.f32 %v339_v0, %v344_v7  ;;  %v348_v9 = vsub.f32 %v340_v2, %v344_v7  ;;  %v352_v10 = vsub.f32 %v342_v5, %v344_v7 }
 0x276   :  { %v346_v11 = vmul.f32 1.442695, %v345_v8  ;;  %v349_v12 = vmul.f32 1.442695, %v348_v9  ;;  %v353_v13 = vmul.f32 1.442695, %v352_v10 }
 0x278   :  { %517 = vpow2.f32 %v346_v11 }
 0x279   :  { %519 = vpow2.f32 %v349_v12 }
 0x27a   :  { %521 = vpow2.f32 %v353_v13 }
 0x282   :  { %v518_v14 = vpop.eup %517 }
 0x283   :  { %v520_v15 = vpop.eup %519 }
 0x284   :  { %v522_v16 = vpop.eup %521  ;;  %v351_v17 = vadd.f32 %v520_v15, %v518_v14 }
 0x286   :  { %v355_v18 = vadd.f32 %v522_v16, %v351_v17 }
 0x288   :  { %523 = vlog2.f32 %v355_v18 }
 0x292   :  { %v524_v19 = vpop.eup %523 }
 0x293   :  { %v357_v20 = vmul.f32 0.6931472, %v524_v19 }
 0x295   :  { %v358_v21 = vadd.f32 %v357_v20, %v344_v7 }
 0x297   :  { %v361_v22 = vadd.f32 %v404_v3, %v358_v21 }
 0x299   :  { %v362_v23 = vsel %vm13_vm1, %v361_v22, -1e+30 }
 0x29a   :  { %v364_v24 = vrot.slane %v362_v23, 7 }
 0x29c   :  { %v366_v25 = vmax.f32 %v362_v23, %v364_v24 }
 0x29e   :  { %v367_v26 = vsub.f32 %v362_v23, %v366_v25  ;;  %v371_v27 = vrot.slane %v366_v25, 1 }
 0x2a0   :  { %v368_v28 = vmul.f32 1.442695, %v367_v26  ;;  %v373_v29 = vsub.f32 %v362_v23, %v371_v27 }
 0x2a2   :  { %v374_v30 = vmul.f32 1.442695, %v373_v29  ;;  %525 = vpow2.f32 %v368_v28 }
 0x2a4   :  { %527 = vpow2.f32 %v374_v30 }
 0x2ac   :  { %v526_v31 = vpop.eup %525 }
 0x2ae   :  { %v528_v32 = vpop.eup %527 }
 0x2af   :  { %v377_v33 = vrot.slane %v528_v32, 7 }
 0x2b1   :  { %v379_v34 = vadd.f32 %v526_v31, %v377_v33 }
 0x2b3   :  { %529 = vlog2.f32 %v379_v34 }
 0x2bd   :  { %v530_v35 = vpop.eup %529 }
 0x2be   :  { %v381_v36 = vmul.f32 0.6931472, %v530_v35 }
 0x2c0   :  { %v382_v37 = vadd.f32 %v381_v36, %v366_v25 }
 0x2c2   :  { %v383_v1 = vsub.f32 0.0, %v382_v37 }
 0x2c4   :  { %385 = vst.msk [vmem:[%s653_s2 - $0x4] sm:$0x10] %vm384_vm2, %v383_v1 }

</bundles_post_ra>
